<compile_context>
chip_gen: v7x
topology: tpu7x:2x2x1
jax: 0.10.0
libtpu: 0.0.40
codegen_flags: <defaults>
</compile_context>

<pallas_src>
import math

import jax
import jax.numpy as jnp
from jax.experimental import pallas as pl
from jax.experimental.pallas import tpu as pltpu


def _round_up(x, m):
    return ((x + m - 1) // m) * m


def _pick_divisor_tile(dim_p, max_tile, step=128):
    """Largest tile <= max_tile (stepping by `step`) that divides dim_p.

    dim_p is assumed to be a positive multiple of `step`."""
    t = min(max_tile, dim_p)
    t -= t % step
    while dim_p % t:
        t -= step
    return t


# --------------------------------------------------------------------------
# Kernel bodies
# --------------------------------------------------------------------------
def _matmul_kernel(a_ref, b_ref, out_ref, acc_ref):
    """out = a @ b, reduction over grid axis 1."""
    k = pl.program_id(1)

    @pl.when(k == 0)
    def _():
        acc_ref[...] = jnp.zeros_like(acc_ref)

    acc_ref[...] += jnp.dot(a_ref[...], b_ref[...],
                            preferred_element_type=jnp.float32)

    @pl.when(k == pl.num_programs(1) - 1)
    def _():
        out_ref[...] = acc_ref[...].astype(out_ref.dtype)


def _matmul_bias_kernel(a_ref, b_ref, bias_ref, out_ref, acc_ref):
    """out = a @ b + bias, reduction over grid axis 1."""
    k = pl.program_id(1)

    @pl.when(k == 0)
    def _():
        acc_ref[...] = jnp.zeros_like(acc_ref)

    acc_ref[...] += jnp.dot(a_ref[...], b_ref[...],
                            preferred_element_type=jnp.float32)

    @pl.when(k == pl.num_programs(1) - 1)
    def _():
        out_ref[...] = (acc_ref[...] + bias_ref[...]).astype(out_ref.dtype)


def _fused_gcn_kernel(adj_ref, x_ref, w_ref, bias_ref, out_ref, acc_ref):
    """out = (adj @ X) @ W + bias, reduction over grid axis 1 (k over N)."""
    k = pl.program_id(1)

    @pl.when(k == 0)
    def _():
        acc_ref[...] = jnp.zeros_like(acc_ref)

    # acc[i] += adj[i, k] @ X[k]    (TM, TK) @ (TK, F_in_p), f32 MXU accumulate.
    acc_ref[...] += jnp.dot(adj_ref[...], x_ref[...],
                            preferred_element_type=jnp.float32)

    # Epilogue exactly once per row tile: project through W, add bias, store.
    @pl.when(k == pl.num_programs(1) - 1)
    def _():
        out = jnp.dot(acc_ref[...], w_ref[...],
                      preferred_element_type=jnp.float32)
        out_ref[...] = (out + bias_ref[...]).astype(out_ref.dtype)


# --------------------------------------------------------------------------
# pallas_call wrappers
# --------------------------------------------------------------------------
def _pallas_matmul(a, b, bias_row, out_dtype, tm, tk, cost=None):
    """Tiled Pallas matmul  a(M,K) @ b(K,Np) [+ bias(1,Np)] -> (M, Np).

    M must be a multiple of tm, K a multiple of tk, Np a multiple of 128."""
    m, kdim = a.shape
    n_p = b.shape[1]
    grid = (m // tm, kdim // tk)

    in_specs = [
        pl.BlockSpec((tm, tk), lambda i, k: (i, k)),
        pl.BlockSpec((tk, n_p), lambda i, k: (k, 0)),
    ]
    args = (a, b)
    kernel = _matmul_kernel
    if bias_row is not None:
        in_specs.append(pl.BlockSpec((1, n_p), lambda i, k: (0, 0)))
        args = (a, b, bias_row)
        kernel = _matmul_bias_kernel

    return pl.pallas_call(
        kernel,
        out_shape=jax.ShapeDtypeStruct((m, n_p), out_dtype),
        grid_spec=pltpu.PrefetchScalarGridSpec(
            num_scalar_prefetch=0,
            grid=grid,
            in_specs=in_specs,
            out_specs=pl.BlockSpec((tm, n_p), lambda i, k: (i, 0)),
            scratch_shapes=[pltpu.VMEM((tm, n_p), jnp.float32)],
        ),
        compiler_params=pltpu.CompilerParams(
            dimension_semantics=("parallel", "arbitrary"),
            vmem_limit_bytes=32 * 1024 * 1024,
        ),
        cost_estimate=cost,
    )(*args)


def graph_convolution(x, adj, weight, bias=None, *, tm=256, tk=512,
                      compute_dtype=None):
    """Pallas implementation of GraphConvolution.forward.

    x:      (N, F_in)     adj: (N, N)     weight: (F_in, F_out)   bias: (F_out,)
    compute_dtype: optionally cast adj/x/weight (e.g. jnp.bfloat16) for the MXU;
                   accumulation and output stay float32-accurate.
    """
    n, f_in = x.shape
    f_out = weight.shape[1]
    assert adj.shape == (n, n)
    assert weight.shape == (f_in, f_out)

    out_dtype = x.dtype
    if compute_dtype is not None:
        adj = adj.astype(compute_dtype)
        x = x.astype(compute_dtype)
        weight = weight.astype(compute_dtype)

    if bias is None:
        # bias=False path: explicit zero bias keeps a single kernel variant.
        bias = jnp.zeros((f_out,), dtype=jnp.float32)

    # Tile sizes for the (N x N) adj contraction:
    #   TM multiple of 8 (sublane), TK multiple of 128 (lane of adj).
    tm = min(tm, _round_up(n, 8))
    tk = min(tk, _round_up(n, 128))

    n_rows_p = _round_up(n, tm)          # padded output rows
    n_k_p = _round_up(n, tk)             # padded contraction dim
    f_in_p = _round_up(f_in, 128)        # lane-dense input-feature width
    f_out_p = _round_up(f_out, 128)      # lane-dense output width

    # Zero-pad operands (zeros contribute nothing; padded rows/cols sliced off).
    adj_p = jnp.zeros((n_rows_p, n_k_p), adj.dtype).at[:n, :n].set(adj)
    w_p = jnp.zeros((f_in_p, f_out_p), weight.dtype).at[:f_in, :f_out].set(weight)
    b_p = (jnp.zeros((1, f_out_p), jnp.float32)
           .at[0, :f_out].set(bias.astype(jnp.float32)))

    grid = (n_rows_p // tm, n_k_p // tk)
    out_isz = jnp.dtype(out_dtype).itemsize

    if f_in <= f_out:
        # ---- Fused path: out = (adj @ X) @ W + b --------------------------
        x_p = jnp.zeros((n_k_p, f_in_p), x.dtype).at[:n, :f_in].set(x)
        cost = pl.CostEstimate(
            flops=2 * n_rows_p * n_k_p * f_in_p
                  + 2 * n_rows_p * f_in_p * f_out_p,
            transcendentals=0,
            bytes_accessed=(adj_p.size * adj_p.dtype.itemsize
                            + x_p.size * x_p.dtype.itemsize * grid[0]
                            + w_p.size * w_p.dtype.itemsize
                            + n_rows_p * f_out_p * out_isz),
        )
        out_p = pl.pallas_call(
            _fused_gcn_kernel,
            out_shape=jax.ShapeDtypeStruct((n_rows_p, f_out_p), out_dtype),
            grid_spec=pltpu.PrefetchScalarGridSpec(
                num_scalar_prefetch=0,
                grid=grid,
                in_specs=[
                    pl.BlockSpec((tm, tk), lambda i, k: (i, k)),           # adj
                    pl.BlockSpec((tk, f_in_p), lambda i, k: (k, 0)),       # X
                    pl.BlockSpec((f_in_p, f_out_p), lambda i, k: (0, 0)),  # W
                    pl.BlockSpec((1, f_out_p), lambda i, k: (0, 0)),       # bias
                ],
                out_specs=pl.BlockSpec((tm, f_out_p), lambda i, k: (i, 0)),
                scratch_shapes=[pltpu.VMEM((tm, f_in_p), jnp.float32)],
            ),
            compiler_params=pltpu.CompilerParams(
                dimension_semantics=("parallel", "arbitrary"),
                vmem_limit_bytes=32 * 1024 * 1024,
            ),
            cost_estimate=cost,
        )(adj_p, x_p, w_p, b_p)
    else:
        # ---- Two-stage path (F_out < F_in): support = X @ W, then adj @ support + b
        # Stage 1: small projection matmul, tiled over rows / F_in.
        tm1 = min(256, _round_up(n, 8))
        n1_p = _round_up(n, tm1)
        tk1 = _pick_divisor_tile(f_in_p, 512)
        x_p = jnp.zeros((n1_p, f_in_p), x.dtype).at[:n, :f_in].set(x)
        support_p = _pallas_matmul(x_p, w_p, None, x.dtype, tm1, tk1)

        # Re-pad support rows to match adj's padded contraction dim.
        support_k = (jnp.zeros((n_k_p, f_out_p), support_p.dtype)
                     .at[:n].set(support_p[:n]))

        # Stage 2: the dominant O(N^2) matmul, accumulator width F_out_p.
        cost = pl.CostEstimate(
            flops=2 * n_rows_p * n_k_p * f_out_p,
            transcendentals=0,
            bytes_accessed=(adj_p.size * adj_p.dtype.itemsize
                            + support_k.size * support_k.dtype.itemsize * grid[0]
                            + n_rows_p * f_out_p * out_isz),
        )
        out_p = _pallas_matmul(adj_p, support_k, b_p, out_dtype, tm, tk,
                               cost=cost)

    return out_p[:n, :f_out]


def _reference(x, adj, weight, bias):
    hi = jax.lax.Precision.HIGHEST
    out = jnp.matmul(adj, jnp.matmul(x, weight, precision=hi), precision=hi)
    if bias is not None:
        out = out + bias
    return out


if __name__ == "__main__":
    key = jax.random.PRNGKey(0)

    def make_case(key, n, f_in, f_out):
        kx, kadj, kw, kb = jax.random.split(key, 4)
        stdv = 1.0 / math.sqrt(f_out)
        w = jax.random.uniform(kw, (f_in, f_out), jnp.float32, -stdv, stdv)
        b = jax.random.uniform(kb, (f_out,), jnp.float32, -stdv, stdv)
        x = jax.random.normal(kx, (n, f_in), jnp.float32)
        adj_raw = jax.random.uniform(kadj, (n, n), jnp.float32)
        adj = adj_raw / jnp.sum(adj_raw, axis=1, keepdims=True)
        return x, adj, w, b

    # ---- 1) small, F_in <= F_out (fused path, single tile) ----------------
    k1, k2, k3 = jax.random.split(key, 3)
    x, adj, w, b = make_case(k1, 8, 16, 32)
    out = jax.block_until_ready(graph_convolution(x, adj, w, b))
    ref = _reference(x, adj, w, b)
    assert out.shape == (8, 32) and out.dtype == jnp.float32
    assert jnp.allclose(out, ref, atol=5e-4, rtol=5e-4)

    # bias=None path (same kernel, zero bias)
    out_nb = jax.block_until_ready(graph_convolution(x, adj, w, None))
    assert jnp.allclose(out_nb, _reference(x, adj, w, None), atol=5e-4, rtol=5e-4)

    # ---- 2) larger, F_in <= F_out (fused path, multi-tile accumulator) ----
    x2, adj2, w2, b2 = make_case(k2, 640, 64, 96)
    out2 = jax.block_until_ready(graph_convolution(x2, adj2, w2, b2))
    ref2 = _reference(x2, adj2, w2, b2)
    assert out2.shape == (640, 96)
    assert jnp.allclose(out2, ref2, atol=5e-4, rtol=5e-4)

    # ---- 3) F_in > F_out (two-stage path, non-aligned dims, multi-tile) ---
    x3, adj3, w3, b3 = make_case(k3, 520, 200, 48)
    out3 = jax.block_until_ready(graph_convolution(x3, adj3, w3, b3))
    ref3 = _reference(x3, adj3, w3, b3)
    assert out3.shape == (520, 48)
    assert jnp.allclose(out3, ref3, atol=5e-4, rtol=5e-4)

    print("KERNEL_OK")
</pallas_src>

<mosaic_0001>
module attributes {stable_mosaic.version = 11 : i64} {
  func.func @_fused_gcn_kernel(%arg0: i32, %arg1: i32, %arg2: memref<8x128xf32, #tpu.memory_space<vmem>>, %arg3: memref<128x128xf32, #tpu.memory_space<vmem>>, %arg4: memref<128x128xf32, #tpu.memory_space<vmem>>, %arg5: memref<1x128xf32, #tpu.memory_space<vmem>>, %arg6: memref<8x128xf32, #tpu.memory_space<vmem>>, %arg7: memref<8x128xf32, #tpu.memory_space<vmem>>) attributes {dimension_semantics = [#tpu.dimension_semantics<parallel>, #tpu.dimension_semantics<arbitrary>], iteration_bounds = array<i64: 1, 1>, scalar_prefetch = 0 : i64, scratch_operands = 1 : i64, tpu.core_type = #tpu.core_type<tc>, window_params = [{transform_indices = @transform_0, window_bounds = array<i64: 8, 128>}, {transform_indices = @transform_1, window_bounds = array<i64: 128, 128>}, {pipeline_mode = #tpu.pipeline_mode<synchronous>, transform_indices = @transform_2, window_bounds = array<i64: 128, 128>}, {pipeline_mode = #tpu.pipeline_mode<synchronous>, transform_indices = @transform_3, window_bounds = array<i64: 1, 128>}, {transform_indices = @transform_4, window_bounds = array<i64: 8, 128>}]} {
    %c0_i32 = arith.constant 0 : i32
    %0 = arith.cmpi eq, %arg1, %c0_i32 : i32
    %1 = arith.extui %0 : i1 to i32
    %c0_i32_0 = arith.constant 0 : i32
    %2 = arith.cmpi ne, %1, %c0_i32_0 : i32
    scf.if %2 {
      %cst_10 = arith.constant 0.000000e+00 : f32
      %12 = vector.broadcast %cst_10 : f32 to vector<8x128xf32>
      %c0_11 = arith.constant 0 : index
      %c0_12 = arith.constant 0 : index
      %13 = vector.load %arg7[%c0_11, %c0_12] : memref<8x128xf32, #tpu.memory_space<vmem>>, vector<8x128xf32>
      tpu.vector_store %arg7[%c0_11, %c0_12], %12 {strides = array<i32>} : memref<8x128xf32, #tpu.memory_space<vmem>>, vector<8x128xf32>,
    } else {
    }
    %c0 = arith.constant 0 : index
    %c0_1 = arith.constant 0 : index
    %3 = vector.load %arg7[%c0, %c0_1] : memref<8x128xf32, #tpu.memory_space<vmem>>, vector<8x128xf32>
    %c0_2 = arith.constant 0 : index
    %c0_3 = arith.constant 0 : index
    %4 = vector.load %arg2[%c0_2, %c0_3] : memref<8x128xf32, #tpu.memory_space<vmem>>, vector<8x128xf32>
    %c0_4 = arith.constant 0 : index
    %c0_5 = arith.constant 0 : index
    %5 = vector.load %arg3[%c0_4, %c0_5] : memref<128x128xf32, #tpu.memory_space<vmem>>, vector<128x128xf32>
    %cst = arith.constant dense<0.000000e+00> : vector<8x128xf32>
    %6 = tpu.matmul %4, %5, %cst {dimension_numbers = #tpu.dot_dimension_numbers<[1], [0], [0], [1], [0, 0, 1, 1], [], []>} : vector<8x128xf32>, vector<128x128xf32>, vector<8x128xf32> -> vector<8x128xf32>
    %7 = arith.addf %3, %6 : vector<8x128xf32>
    %c0_6 = arith.constant 0 : index
    %c0_7 = arith.constant 0 : index
    %8 = vector.load %arg7[%c0_6, %c0_7] : memref<8x128xf32, #tpu.memory_space<vmem>>, vector<8x128xf32>
    tpu.vector_store %arg7[%c0_6, %c0_7], %7 {strides = array<i32>} : memref<8x128xf32, #tpu.memory_space<vmem>>, vector<8x128xf32>,
    %c0_i32_8 = arith.constant 0 : i32
    %9 = arith.cmpi eq, %arg1, %c0_i32_8 : i32
    %10 = arith.extui %9 : i1 to i32
    %c0_i32_9 = arith.constant 0 : i32
    %11 = arith.cmpi ne, %10, %c0_i32_9 : i32
    scf.if %11 {
      %c0_10 = arith.constant 0 : index
      %c0_11 = arith.constant 0 : index
      %12 = vector.load %arg7[%c0_10, %c0_11] : memref<8x128xf32, #tpu.memory_space<vmem>>, vector<8x128xf32>
      %c0_12 = arith.constant 0 : index
      %c0_13 = arith.constant 0 : index
      %13 = vector.load %arg4[%c0_12, %c0_13] : memref<128x128xf32, #tpu.memory_space<vmem>>, vector<128x128xf32>
      %cst_14 = arith.constant dense<0.000000e+00> : vector<8x128xf32>
      %14 = tpu.matmul %12, %13, %cst_14 {dimension_numbers = #tpu.dot_dimension_numbers<[1], [0], [0], [1], [0, 0, 1, 1], [], []>} : vector<8x128xf32>, vector<128x128xf32>, vector<8x128xf32> -> vector<8x128xf32>
      %c0_15 = arith.constant 0 : index
      %c0_16 = arith.constant 0 : index
      %15 = vector.load %arg5[%c0_15, %c0_16] : memref<1x128xf32, #tpu.memory_space<vmem>>, vector<1x128xf32>
      %16 = vector.broadcast %15 : vector<1x128xf32> to vector<8x128xf32>
      %17 = arith.addf %14, %16 : vector<8x128xf32>
      %c0_17 = arith.constant 0 : index
      %c0_18 = arith.constant 0 : index
      %18 = vector.load %arg6[%c0_17, %c0_18] : memref<8x128xf32, #tpu.memory_space<vmem>>, vector<8x128xf32>
      tpu.vector_store %arg6[%c0_17, %c0_18], %17 {strides = array<i32>} : memref<8x128xf32, #tpu.memory_space<vmem>>, vector<8x128xf32>,
    } else {
    }
    return
  }
  func.func @transform_0(%arg0: i32, %arg1: i32) -> (i32, i32) {
    %c0_i32 = arith.constant 0 : i32
    return %arg0, %arg1 : i32, i32
  }
  func.func @transform_1(%arg0: i32, %arg1: i32) -> (i32, i32) {
    %c0_i32 = arith.constant 0 : i32
    %c0_i32_0 = arith.constant 0 : i32
    return %arg1, %c0_i32 : i32, i32
  }
  func.func @transform_2(%arg0: i32, %arg1: i32) -> (i32, i32) {
    %c0_i32 = arith.constant 0 : i32
    %c0_i32_0 = arith.constant 0 : i32
    %c0_i32_1 = arith.constant 0 : i32
    return %c0_i32, %c0_i32_0 : i32, i32
  }
  func.func @transform_3(%arg0: i32, %arg1: i32) -> (i32, i32) {
    %c0_i32 = arith.constant 0 : i32
    %c0_i32_0 = arith.constant 0 : i32
    %c0_i32_1 = arith.constant 0 : i32
    return %c0_i32, %c0_i32_0 : i32, i32
  }
  func.func @transform_4(%arg0: i32, %arg1: i32) -> (i32, i32) {
    %c0_i32 = arith.constant 0 : i32
    %c0_i32_0 = arith.constant 0 : i32
    return %arg0, %c0_i32 : i32, i32
  }
}

</mosaic_0001>

<bundles_post_ra>
// kernel: tpu_custom_call.1
= control target key start
LH: loop header
LB: loop body
LE: loop exit
PB: predicated region body
PF: predicated region fallthrough
CT: control target
= control target key end

     0   :  { %9 = vsyncpa [#allocation4], 0  ;;  %s629_s0 = inlined_call_operand.hbm [shape: f32[8,128], index: 0, kind: input, shape index: {}]   ;;  %s630_s1 = inlined_call_operand.hbm [shape: f32[128,128], index: 1, kind: input, shape index: {}]   ;;  %s631_s2 = inlined_call_operand.hbm [shape: f32[128,128], index: 2, kind: input, shape index: {}]   ;;  %s632_s3 = inlined_call_operand.vmem [shape: f32[1,128], index: 3, kind: input, shape index: {}]   ;;  %s633_s4 = inlined_call_operand.hbm [shape: f32[8,128], index: 4, kind: output, shape index: {}]  }
   0x1   :  { %10 = vsyncpa [#allocation7], 0 }
   0x2   :  { %11 = vsyncpa [#allocation5], 0  ;;  %s522_s15 = smov [#allocation6]   ;;  %s428_s19 = scalar_lea.hbm %s630_s1, 2048 }
   0x3   :  { %s27_s16 = sshll.u32 %s522_s15, 4  ;;  %p429_p0 = scmp.ne.s32.totalorder %s630_s1, %s428_s19  ;;  %s28_s16 = int_to_ptr.vmem [resolvable:$true] %s27_s16 }
   0x4   :  { %p432_p1 = scmp.lt.u32.totalorder %s428_s19, %s630_s1 }
   0x6   :  { %p434_p2 = pnand %p432_p1, %p429_p0 }
   0x8   :  { %437 = shalt.err (!%p434_p2)
}
   0x9   :  { %s438_s24 = scalar_lea.vmem %s28_s16, 2048  ;;  %p443_p4 = scmp.lt.s32.totalorder %s28_s16, %s28_s16 }
   0xa   :  { %p439_p3 = scmp.ne.s32.totalorder %s28_s16, %s438_s24  ;;  %p444_p5 = scmp.lt.s32.totalorder %s438_s24, %s438_s24 }
   0xc   :  { %p445_p6 = por %p444_p5, %p443_p4 }
   0xe   :  { %p446_p7 = pnand %p445_p6, %p439_p3 }
  0x10   :  { %449 = shalt.err (!%p446_p7)
}
  0x11   :  { %s523_s25 = smov 128   ;;  %s524_s26 = smov 8  }
  0x12   :  { %33 = dma.hbm_to_vmem [thread:$0]  %s630_s1, 2048, %s28_s16, [#allocation7], %s523_s25, %s523_s25, %s524_s26  }
  0x13   :  { %s525_s29 = smov [#allocation3]   ;;  %s526_s5 = smov [#allocation8]  }
  0x14   :  { %s18_s30 = sshll.u32 %s525_s29, 4  ;;  %s39_s6 = sshll.u32 %s526_s5, 4  ;;  %s19_s30 = int_to_ptr.vmem [resolvable:$true] %s18_s30  ;;  %s40_s6 = int_to_ptr.vmem [resolvable:$true] %s39_s6 }
  0x15   :  { %s450_s9 = scalar_lea.hbm %s629_s0, 128 }
  0x16   :  { %p451_p8 = scmp.ne.s32.totalorder %s629_s0, %s450_s9  ;;  %p454_p9 = scmp.lt.u32.totalorder %s450_s9, %s629_s0 }
  0x18   :  { %p456_p10 = pnand %p454_p9, %p451_p8 }
  0x1a   :  { %459 = shalt.err (!%p456_p10)
}
  0x1b   :  { %s460_s1 = scalar_lea.vmem %s19_s30, 128  ;;  %p465_p12 = scmp.lt.s32.totalorder %s19_s30, %s19_s30 }
  0x1c   :  { %p461_p11 = scmp.ne.s32.totalorder %s19_s30, %s460_s1  ;;  %p466_p13 = scmp.lt.s32.totalorder %s460_s1, %s460_s1 }
  0x1e   :  { %p467_p0 = por %p466_p13, %p465_p12 }
  0x20   :  { %p468_p1 = pnand %p467_p0, %p461_p11 }
  0x22   :  { %471 = shalt.err (!%p468_p1)
}
  0x23   :  { %21 = dma.hbm_to_vmem [thread:$0]  %s629_s0, 128, %s19_s30, [#allocation4]  }
  0x24   :  { %s472_s18 = scalar_lea.hbm %s631_s2, 2048 }
  0x25   :  { %p473_p2 = scmp.ne.s32.totalorder %s631_s2, %s472_s18  ;;  %p476_p3 = scmp.lt.u32.totalorder %s472_s18, %s631_s2 }
  0x27   :  { %p478_p4 = pnand %p476_p3, %p473_p2 }
  0x29   :  { %481 = shalt.err (!%p478_p4)
}
  0x2a   :  { %s482_s23 = scalar_lea.vmem %s40_s6, 2048  ;;  %p487_p6 = scmp.lt.s32.totalorder %s40_s6, %s40_s6 }
  0x2b   :  { %p483_p5 = scmp.ne.s32.totalorder %s40_s6, %s482_s23  ;;  %p488_p7 = scmp.lt.s32.totalorder %s482_s23, %s482_s23 }
  0x2d   :  { %p489_p8 = por %p488_p7, %p487_p6 }
  0x2f   :  { %p490_p9 = pnand %p489_p8, %p483_p5 }
  0x31   :  { %493 = shalt.err (!%p490_p9)
}
  0x32   :  { %45 = dma.hbm_to_vmem [thread:$0]  %s631_s2, 2048, %s40_s6, [#allocation7], %s523_s25, %s523_s25, %s524_s26  }
  0x33   :  { %516 = dma.done.wait [#allocation4], 128  }
  0x34   :  { %517 = vsyncadd [#allocation4], 4294967168 }
  0x35   :  { %518 = dma.done.wait [#allocation7], 4096  }
  0x36   :  { %519 = vsyncadd [#allocation7], 4294963200  ;;  %v527_v0 = vmov 0.0|0.0   ;;  %vm528_vm0 = vmmov 0   ;;  %v529_v1 = vmov 0.0   ;;  %v64_v2 = vld [vmem:[#allocation6] sm:$0xff] }
  0x37   :  { %371 = vmatprep.subr.bf16.mxu0 %v527_v0  ;;  %333 = vmatprep.mubr.msk.f32.mxu0 %vm528_vm0, %v529_v1  ;;  %v65_v3 = vld [vmem:[#allocation6 + $0x8] sm:$0xff]  ;;  %v66_v4 = vld [vmem:[#allocation6 + $0x10] sm:$0xff]  ;;  %v67_v6 = vld [vmem:[#allocation6 + $0x18] sm:$0xff]  ;;  %s530_s26 = smov [#allocation9]  }
  0x38   :  { %395 = vmatprep.subr.bf16.mxu1 %v527_v0  ;;  %368 = vmatprep.mubr.msk.f32.mxu1 %vm528_vm0, %v529_v1  ;;  %v372_v5 = vpack.c.bf16 %v65_v3, %v64_v2  ;;  %v375_v7 = vpack.c.bf16 %v67_v6, %v66_v4  ;;  %v68_v8 = vld [vmem:[#allocation6 + $0x20] sm:$0xff]  ;;  %v69_v9 = vld [vmem:[#allocation6 + $0x28] sm:$0xff]  ;;  %v158_v12 = vld [vmem:[#allocation8 + $0x10] sm:$0xff]  ;;  %s256_s27 = sshll.u32 %s530_s26, 4  ;;  %s257_s27 = int_to_ptr.vmem [resolvable:$true] %s256_s27 }
  0x39   :  { %v156_v10 = vld [vmem:[#allocation8] sm:$0xff]  ;;  %v157_v11 = vld [vmem:[#allocation8 + $0x8] sm:$0xff]  ;;  %v159_v13 = vld [vmem:[#allocation8 + $0x18] sm:$0xff]  ;;  %v378_v14 = vpack.c.bf16 %v69_v9, %v68_v8  ;;  %s494_s28 = scalar_lea.vmem %s257_s27, 128  ;;  %p499_p11 = scmp.lt.s32.totalorder %s257_s27, %s257_s27 }
  0x3a   :  { %373 = vmatpush3.bf16.msra.mxu0 %v372_v5  ;;  %v396_v15 = vpack.c.bf16 %v157_v11, %v156_v10  ;;  %v70_v16 = vld [vmem:[#allocation6 + $0x30] sm:$0xff]  ;;  %v71_v17 = vld [vmem:[#allocation6 + $0x38] sm:$0xff]  ;;  %v399_v18 = vpack.c.bf16 %v159_v13, %v158_v12  ;;  %v160_v19 = vld [vmem:[#allocation8 + $0x20] sm:$0xff]  ;;  %p495_p10 = scmp.ne.s32.totalorder %s257_s27, %s494_s28  ;;  %p500_p12 = scmp.lt.s32.totalorder %s494_s28, %s494_s28 }
  0x3b   :  { %374 = vmatprep.subr.bf16.mxu0 %v527_v0  ;;  %v161_v20 = vld [vmem:[#allocation8 + $0x28] sm:$0xff]  ;;  %v381_v21 = vpack.c.bf16 %v71_v17, %v70_v16  ;;  %v72_v22 = vld [vmem:[#allocation6 + $0x40] sm:$0xff]  ;;  %v162_v25 = vld [vmem:[#allocation8 + $0x30] sm:$0xff] }
  0x3c   :  { %397 = vmatpush3.bf16.msra.mxu1 %v396_v15  ;;  %v73_v23 = vld [vmem:[#allocation6 + $0x48] sm:$0xff]  ;;  %v402_v24 = vpack.c.bf16 %v161_v20, %v160_v19  ;;  %v163_v26 = vld [vmem:[#allocation8 + $0x38] sm:$0xff]  ;;  %v74_v28 = vld [vmem:[#allocation6 + $0x50] sm:$0xff]  ;;  %p501_p13 = por %p500_p12, %p499_p11 }
  0x3d   :  { %398 = vmatprep.subr.bf16.mxu1 %v527_v0  ;;  %v384_v27 = vpack.c.bf16 %v73_v23, %v72_v22  ;;  %v75_v29 = vld [vmem:[#allocation6 + $0x58] sm:$0xff]  ;;  %v405_v30 = vpack.c.bf16 %v163_v26, %v162_v25  ;;  %v164_v31 = vld [vmem:[#allocation8 + $0x40] sm:$0xff]  ;;  %v165_v32 = vld [vmem:[#allocation8 + $0x48] sm:$0xff] }
  0x3e   :  { %376 = vmatpush3.bf16.msra.mxu0 %v375_v7  ;;  %v387_v33 = vpack.c.bf16 %v75_v29, %v74_v28  ;;  %v76_v34 = vld [vmem:[#allocation6 + $0x60] sm:$0xff]  ;;  %v77_v35 = vld [vmem:[#allocation6 + $0x68] sm:$0xff]  ;;  %v408_v36 = vpack.c.bf16 %v165_v32, %v164_v31  ;;  %v166_v37 = vld [vmem:[#allocation8 + $0x50] sm:$0xff]  ;;  %p502_p0 = pnand %p501_p13, %p495_p10 }
  0x3f   :  { %377 = vmatprep.subr.bf16.mxu0 %v527_v0  ;;  %v167_v38 = vld [vmem:[#allocation8 + $0x58] sm:$0xff]  ;;  %v390_v39 = vpack.c.bf16 %v77_v35, %v76_v34  ;;  %v78_v40 = vld [vmem:[#allocation6 + $0x70] sm:$0xff]  ;;  %v168_v43 = vld [vmem:[#allocation8 + $0x60] sm:$0xff] }
  0x40   :  { %400 = vmatpush3.bf16.msra.mxu1 %v399_v18  ;;  %v79_v41 = vld [vmem:[#allocation6 + $0x78] sm:$0xff]  ;;  %v411_v42 = vpack.c.bf16 %v167_v38, %v166_v37  ;;  %v169_v44 = vld [vmem:[#allocation8 + $0x68] sm:$0xff]  ;;  %v170_v47 = vld [vmem:[#allocation8 + $0x70] sm:$0xff] }
  0x41   :  { %401 = vmatprep.subr.bf16.mxu1 %v527_v0  ;;  %v393_v45 = vpack.c.bf16 %v79_v41, %v78_v40  ;;  %v414_v46 = vpack.c.bf16 %v169_v44, %v168_v43  ;;  %v171_v48 = vld [vmem:[#allocation8 + $0x78] sm:$0xff] }
  0x42   :  { %379 = vmatpush3.bf16.msra.mxu0 %v378_v14  ;;  %v63_v49 = vld [vmem:[#allocation3] sm:$0xff]  ;;  %v417_v50 = vpack.c.bf16 %v171_v48, %v170_v47 }
  0x43   :  { %380 = vmatprep.subr.bf16.mxu0 %v527_v0  ;;  %v266_v53 = vld [vmem:[%s632_s3] ss:$0 sm:$0xff] }
  0x44   :  { %403 = vmatpush3.bf16.msra.mxu1 %v402_v24 }
  0x45   :  { %404 = vmatprep.subr.bf16.mxu1 %v527_v0 }
  0x46   :  { %382 = vmatpush3.bf16.msra.mxu0 %v381_v21 }
  0x47   :  { %383 = vmatprep.subr.bf16.mxu0 %v527_v0 }
  0x48   :  { %406 = vmatpush3.bf16.msra.mxu1 %v405_v30 }
  0x49   :  { %407 = vmatprep.subr.bf16.mxu1 %v527_v0 }
  0x4a   :  { %385 = vmatpush3.bf16.msra.mxu0 %v384_v27 }
  0x4b   :  { %386 = vmatprep.subr.bf16.mxu0 %v527_v0 }
  0x4c   :  { %409 = vmatpush3.bf16.msra.mxu1 %v408_v36 }
  0x4d   :  { %410 = vmatprep.subr.bf16.mxu1 %v527_v0 }
  0x4e   :  { %388 = vmatpush3.bf16.msra.mxu0 %v387_v33 }
  0x4f   :  { %389 = vmatprep.subr.bf16.mxu0 %v527_v0 }
  0x50   :  { %412 = vmatpush3.bf16.msra.mxu1 %v411_v42 }
  0x51   :  { %413 = vmatprep.subr.bf16.mxu1 %v527_v0 }
  0x52   :  { %391 = vmatpush3.bf16.msra.mxu0 %v390_v39 }
  0x53   :  { %392 = vmatprep.subr.bf16.mxu0 %v527_v0 }
  0x54   :  { %415 = vmatpush3.bf16.msra.mxu1 %v414_v46 }
  0x55   :  { %416 = vmatprep.subr.bf16.mxu1 %v527_v0 }
  0x56   :  { %394 = vmatpush3.bf16.msra.mxu0 %v393_v45 }
  0x58   :  { %418 = vmatpush3.bf16.msra.mxu1 %v417_v50 }
  0x59   :  { %334 = vmatmul.mubr.f32.vlgmr.msra.gmra.mrb[0].mxu0 %v63_v49 }
 0x12c   :  { %v146_v51 = vpop.f32.mrb[0].mxu0 }
 0x12d   :  { %v335_v52 = vpop.f32.mrb[1].mxu0  ;;  %369 = vmatmul.mubr.f32.vlgmr.msra.gmra.mrb[0].mxu1 %v146_v51 }
 0x200   :  { %v245_v54 = vpop.f32.mrb[0].mxu1 }
 0x201   :  { %v246_v55 = vadd.f32 %v266_v53, %v245_v54  ;;  %v370_v56 = vpop.f32.mrb[1].mxu1 }
 0x203   :  { %249 = vst [vmem:[#allocation9] sm:$0xff] %v246_v55 }
 0x204   :  { %505 = shalt.err (!%p502_p0)
}
 0x205   :  { %s506_s5 = scalar_lea.hbm %s633_s4, 128 }
 0x206   :  { %p507_p1 = scmp.ne.s32.totalorder %s633_s4, %s506_s5  ;;  %p510_p2 = scmp.lt.u32.totalorder %s506_s5, %s633_s4 }
 0x208   :  { %p512_p3 = pnand %p510_p2, %p507_p1 }
 0x20a   :  { %515 = shalt.err (!%p512_p3)
}
 0x20b   :  { %259 = dma.vmem_to_hbm [thread:$0]  %s257_s27, 128, %s633_s4, [#allocation5]  }
 0x20c   :  { %520 = dma.done.wait [#allocation5], 128  }
 0x20d   :  { %521 = vsyncadd [#allocation5], 4294967168 }
 0x20e   :  { %263 = vsyncpa [#allocation4], 1 }
 0x20f   :  { %264 = vsyncpa [#allocation7], 1 }
 0x210   :  { %265 = vsyncpa [#allocation5], 1 }

</bundles_post_ra>
